<compile_context>
chip_gen: v5e
topology: v5e:2x2
jax: 0.10.0
libtpu: 0.0.40
codegen_flags: <defaults>
</compile_context>

<pallas_src>
import functools

import jax
import jax.numpy as jnp
from jax.experimental import pallas as pl
from jax.experimental.pallas import tpu as pltpu

INPUT_SIZE = 200
HIDDEN_SIZE = 512
INTERMEDIATE_SIZE = 256
BN_EPS = 1e-5

PADDED_INPUT = 256   # 200 -> 256: multiple of 128 lanes / clean MXU K dim
PADDED_OUT = 128     # 1   -> 128: lane-dense output store (column 0 is the result)


def _round_up(n, m):
    return (n + m - 1) // m * m


def emotion_mlp_kernel(x_ref, w1_ref, c1_ref, w2_ref, c2_ref, w3_ref, b3_ref, o_ref):
    # fc1 (+ folded bn1) -> relu      (dropout is identity in eval mode)
    h = jnp.dot(x_ref[...], w1_ref[...], preferred_element_type=jnp.float32)
    h = jnp.maximum(h + c1_ref[...], 0.0)
    # fc2 (+ folded bn2) -> relu
    h = jnp.dot(h.astype(jnp.bfloat16), w2_ref[...], preferred_element_type=jnp.float32)
    h = jnp.maximum(h + c2_ref[...], 0.0)
    # fc3 (N padded to 128 lanes; only column 0 is meaningful)
    y = jnp.dot(h.astype(jnp.bfloat16), w3_ref[...], preferred_element_type=jnp.float32)
    o_ref[...] = (y + b3_ref[...]).astype(o_ref.dtype)


@functools.partial(jax.jit, static_argnames=("block_b",))
def emotion_mlp_forward(x, params, *, block_b=512):
    """x: [B, INPUT_SIZE] float32.  params: dict of JAX arrays (see init_params)."""
    B, F = x.shape
    assert F == INPUT_SIZE

    # ---- fold eval-mode BatchNorm + linear bias into the weights (done once, jitted) ----
    def fold(w, b, gamma, beta, rmean, rvar):
        scale = gamma / jnp.sqrt(rvar + BN_EPS)
        shift = beta - rmean * scale
        w_f = w * scale[None, :]                      # per-output-column scale
        c_f = (b * scale + shift).reshape(1, -1)      # fused bias + BN shift
        return w_f, c_f.astype(jnp.float32)

    w1f, c1 = fold(params["w1"], params["b1"], params["bn1_gamma"], params["bn1_beta"],
                   params["bn1_mean"], params["bn1_var"])
    w2f, c2 = fold(params["w2"], params["b2"], params["bn2_gamma"], params["bn2_beta"],
                   params["bn2_mean"], params["bn2_var"])

    # pad / cast weights (bf16 for MXU-rate matmuls, f32 accumulation inside the kernel)
    w1p = jnp.pad(w1f, ((0, PADDED_INPUT - INPUT_SIZE), (0, 0))).astype(jnp.bfloat16)
    w2p = w2f.astype(jnp.bfloat16)
    w3p = jnp.pad(params["w3"], ((0, 0), (0, PADDED_OUT - 1))).astype(jnp.bfloat16)
    b3p = jnp.pad(params["b3"], (0, PADDED_OUT - 1)).reshape(1, -1).astype(jnp.float32)

    # pad batch to the tile (>=8 sublanes) and features to 256; cast activations to bf16
    tb = min(block_b, _round_up(B, 8))
    b_pad = _round_up(B, tb)
    xp = jnp.pad(x, ((0, b_pad - B), (0, PADDED_INPUT - INPUT_SIZE))).astype(jnp.bfloat16)

    n_tiles = b_pad // tb
    flops_per_row = 2 * (PADDED_INPUT * HIDDEN_SIZE
                         + HIDDEN_SIZE * INTERMEDIATE_SIZE
                         + INTERMEDIATE_SIZE * PADDED_OUT)
    weight_bytes = (w1p.size + w2p.size + w3p.size) * 2 + (c1.size + c2.size + b3p.size) * 4
    cost = pl.CostEstimate(
        flops=flops_per_row * b_pad,
        transcendentals=0,
        bytes_accessed=xp.size * 2 + b_pad * PADDED_OUT * 4 + weight_bytes,
    )

    const = lambda i: (0, 0)   # weights / constants: VMEM-resident across all grid steps
    out = pl.pallas_call(
        emotion_mlp_kernel,
        out_shape=jax.ShapeDtypeStruct((b_pad, PADDED_OUT), jnp.float32),
        grid_spec=pltpu.PrefetchScalarGridSpec(
            num_scalar_prefetch=0,
            grid=(n_tiles,),
            in_specs=[
                pl.BlockSpec((tb, PADDED_INPUT), lambda i: (i, 0)),          # x tile
                pl.BlockSpec((PADDED_INPUT, HIDDEN_SIZE), const),            # W1'
                pl.BlockSpec((1, HIDDEN_SIZE), const),                       # c1
                pl.BlockSpec((HIDDEN_SIZE, INTERMEDIATE_SIZE), const),       # W2'
                pl.BlockSpec((1, INTERMEDIATE_SIZE), const),                 # c2
                pl.BlockSpec((INTERMEDIATE_SIZE, PADDED_OUT), const),        # W3 (padded)
                pl.BlockSpec((1, PADDED_OUT), const),                        # b3 (padded)
            ],
            out_specs=pl.BlockSpec((tb, PADDED_OUT), lambda i: (i, 0)),
        ),
        compiler_params=pltpu.CompilerParams(
            dimension_semantics=("parallel",),   # shard batch tiles across TCs on v7x
        ),
        cost_estimate=cost,
    )(xp, w1p, c1, w2p, c2, w3p, b3p)

    return out[:B, :1]


def init_params(key):
    """Deterministic synthetic parameters with the same shapes as the PyTorch module."""
    ks = jax.random.split(key, 10)

    def linear(kw, kb, fan_in, fan_out):
        bound = 1.0 / jnp.sqrt(fan_in)
        # stored as [in, out] so kernel computes x @ W (== PyTorch x @ W.T with W [out, in])
        w = jax.random.uniform(kw, (fan_in, fan_out), jnp.float32, -bound, bound)
        b = jax.random.uniform(kb, (fan_out,), jnp.float32, -bound, bound)
        return w, b

    w1, b1 = linear(ks[0], ks[1], INPUT_SIZE, HIDDEN_SIZE)
    w2, b2 = linear(ks[2], ks[3], HIDDEN_SIZE, INTERMEDIATE_SIZE)
    w3, b3 = linear(ks[4], ks[5], INTERMEDIATE_SIZE, 1)

    params = dict(
        w1=w1, b1=b1,
        w2=w2, b2=b2,
        w3=w3, b3=b3,
        # BatchNorm eval-mode parameters / running statistics (deterministic, nontrivial)
        bn1_gamma=1.0 + 0.1 * jax.random.normal(ks[6], (HIDDEN_SIZE,), jnp.float32),
        bn1_beta=0.05 * jax.random.normal(ks[7], (HIDDEN_SIZE,), jnp.float32),
        bn1_mean=0.02 * jnp.arange(HIDDEN_SIZE, dtype=jnp.float32) / HIDDEN_SIZE,
        bn1_var=jnp.ones((HIDDEN_SIZE,), jnp.float32)
                + 0.1 * jnp.cos(jnp.arange(HIDDEN_SIZE, dtype=jnp.float32)) ** 2,
        bn2_gamma=1.0 + 0.1 * jax.random.normal(ks[8], (INTERMEDIATE_SIZE,), jnp.float32),
        bn2_beta=0.05 * jax.random.normal(ks[9], (INTERMEDIATE_SIZE,), jnp.float32),
        bn2_mean=0.01 * jnp.arange(INTERMEDIATE_SIZE, dtype=jnp.float32) / INTERMEDIATE_SIZE,
        bn2_var=jnp.ones((INTERMEDIATE_SIZE,), jnp.float32)
                + 0.05 * jnp.sin(jnp.arange(INTERMEDIATE_SIZE, dtype=jnp.float32)) ** 2,
    )
    return params


def reference_forward(x, params):
    """Pure-JAX f32 reference with identical semantics (for a sanity check)."""
    def bn(h, g, b, m, v):
        return (h - m) / jnp.sqrt(v + BN_EPS) * g + b

    h = x @ params["w1"] + params["b1"]
    h = jnp.maximum(bn(h, params["bn1_gamma"], params["bn1_beta"],
                       params["bn1_mean"], params["bn1_var"]), 0.0)
    h = h @ params["w2"] + params["b2"]
    h = jnp.maximum(bn(h, params["bn2_gamma"], params["bn2_beta"],
                       params["bn2_mean"], params["bn2_var"]), 0.0)
    return h @ params["w3"] + params["b3"]


if __name__ == "__main__":
    key = jax.random.PRNGKey(0)
    k_x, k_p = jax.random.split(key)

    B = 12  # small batch, deliberately not a multiple of 8 to exercise tail padding
    x = jax.random.normal(k_x, (B, INPUT_SIZE), jnp.float32)
    params = init_params(k_p)

    out = emotion_mlp_forward(x, params)
    out = jax.block_until_ready(out)

    ref = reference_forward(x, params)
    assert out.shape == (B, 1), out.shape
    # bf16 MXU inputs with f32 accumulation: loose-ish tolerance vs. the pure-f32 reference
    assert jnp.allclose(out, ref, atol=3e-2, rtol=3e-2), float(jnp.max(jnp.abs(out - ref)))

    # TODO(synk): training-mode dropout / batch-statistic BatchNorm not implemented
    # (forward here matches PyTorch module.eval() semantics).
    print("KERNEL_OK")
</pallas_src>

<mosaic_0001>
module attributes {stable_mosaic.version = 11 : i64} {
  func.func @emotion_mlp_kernel(%arg0: i32, %arg1: memref<16x256xbf16, #tpu.memory_space<vmem>>, %arg2: memref<256x512xbf16, #tpu.memory_space<vmem>>, %arg3: memref<1x512xf32, #tpu.memory_space<vmem>>, %arg4: memref<512x256xbf16, #tpu.memory_space<vmem>>, %arg5: memref<1x256xf32, #tpu.memory_space<vmem>>, %arg6: memref<256x128xbf16, #tpu.memory_space<vmem>>, %arg7: memref<1x128xf32, #tpu.memory_space<vmem>>, %arg8: memref<16x128xf32, #tpu.memory_space<vmem>>) attributes {dimension_semantics = [#tpu.dimension_semantics<parallel>], iteration_bounds = array<i64: 1>, scalar_prefetch = 0 : i64, scratch_operands = 0 : i64, tpu.core_type = #tpu.core_type<tc>, window_params = [{transform_indices = @transform_0, window_bounds = array<i64: 16, 256>}, {pipeline_mode = #tpu.pipeline_mode<synchronous>, transform_indices = @transform_1, window_bounds = array<i64: 256, 512>}, {pipeline_mode = #tpu.pipeline_mode<synchronous>, transform_indices = @transform_2, window_bounds = array<i64: 1, 512>}, {pipeline_mode = #tpu.pipeline_mode<synchronous>, transform_indices = @transform_3, window_bounds = array<i64: 512, 256>}, {pipeline_mode = #tpu.pipeline_mode<synchronous>, transform_indices = @transform_4, window_bounds = array<i64: 1, 256>}, {pipeline_mode = #tpu.pipeline_mode<synchronous>, transform_indices = @transform_5, window_bounds = array<i64: 256, 128>}, {pipeline_mode = #tpu.pipeline_mode<synchronous>, transform_indices = @transform_6, window_bounds = array<i64: 1, 128>}, {transform_indices = @transform_7, window_bounds = array<i64: 16, 128>}]} {
    %c0 = arith.constant 0 : index
    %c0_0 = arith.constant 0 : index
    %0 = vector.load %arg1[%c0, %c0_0] : memref<16x256xbf16, #tpu.memory_space<vmem>>, vector<16x256xbf16>
    %c0_1 = arith.constant 0 : index
    %c0_2 = arith.constant 0 : index
    %1 = vector.load %arg2[%c0_1, %c0_2] : memref<256x512xbf16, #tpu.memory_space<vmem>>, vector<256x512xbf16>
    %cst = arith.constant dense<0.000000e+00> : vector<16x512xf32>
    %2 = tpu.matmul %0, %1, %cst {dimension_numbers = #tpu.dot_dimension_numbers<[1], [0], [0], [1], [0, 0, 1, 1], [], []>} : vector<16x256xbf16>, vector<256x512xbf16>, vector<16x512xf32> -> vector<16x512xf32>
    %c0_3 = arith.constant 0 : index
    %c0_4 = arith.constant 0 : index
    %3 = vector.load %arg3[%c0_3, %c0_4] : memref<1x512xf32, #tpu.memory_space<vmem>>, vector<1x512xf32>
    %4 = vector.broadcast %3 : vector<1x512xf32> to vector<16x512xf32>
    %5 = arith.addf %2, %4 : vector<16x512xf32>
    %cst_5 = arith.constant 0.000000e+00 : f32
    %6 = vector.broadcast %cst_5 : f32 to vector<16x512xf32>
    %7 = arith.maximumf %5, %6 : vector<16x512xf32>
    %8 = arith.truncf %7 : vector<16x512xf32> to vector<16x512xbf16>
    %c0_6 = arith.constant 0 : index
    %c0_7 = arith.constant 0 : index
    %9 = vector.load %arg4[%c0_6, %c0_7] : memref<512x256xbf16, #tpu.memory_space<vmem>>, vector<512x256xbf16>
    %cst_8 = arith.constant dense<0.000000e+00> : vector<16x256xf32>
    %10 = tpu.matmul %8, %9, %cst_8 {dimension_numbers = #tpu.dot_dimension_numbers<[1], [0], [0], [1], [0, 0, 1, 1], [], []>} : vector<16x512xbf16>, vector<512x256xbf16>, vector<16x256xf32> -> vector<16x256xf32>
    %c0_9 = arith.constant 0 : index
    %c0_10 = arith.constant 0 : index
    %11 = vector.load %arg5[%c0_9, %c0_10] : memref<1x256xf32, #tpu.memory_space<vmem>>, vector<1x256xf32>
    %12 = vector.broadcast %11 : vector<1x256xf32> to vector<16x256xf32>
    %13 = arith.addf %10, %12 : vector<16x256xf32>
    %cst_11 = arith.constant 0.000000e+00 : f32
    %14 = vector.broadcast %cst_11 : f32 to vector<16x256xf32>
    %15 = arith.maximumf %13, %14 : vector<16x256xf32>
    %16 = arith.truncf %15 : vector<16x256xf32> to vector<16x256xbf16>
    %c0_12 = arith.constant 0 : index
    %c0_13 = arith.constant 0 : index
    %17 = vector.load %arg6[%c0_12, %c0_13] : memref<256x128xbf16, #tpu.memory_space<vmem>>, vector<256x128xbf16>
    %cst_14 = arith.constant dense<0.000000e+00> : vector<16x128xf32>
    %18 = tpu.matmul %16, %17, %cst_14 {dimension_numbers = #tpu.dot_dimension_numbers<[1], [0], [0], [1], [0, 0, 1, 1], [], []>} : vector<16x256xbf16>, vector<256x128xbf16>, vector<16x128xf32> -> vector<16x128xf32>
    %c0_15 = arith.constant 0 : index
    %c0_16 = arith.constant 0 : index
    %19 = vector.load %arg7[%c0_15, %c0_16] : memref<1x128xf32, #tpu.memory_space<vmem>>, vector<1x128xf32>
    %20 = vector.broadcast %19 : vector<1x128xf32> to vector<16x128xf32>
    %21 = arith.addf %18, %20 : vector<16x128xf32>
    %c0_17 = arith.constant 0 : index
    %c0_18 = arith.constant 0 : index
    %22 = vector.load %arg8[%c0_17, %c0_18] : memref<16x128xf32, #tpu.memory_space<vmem>>, vector<16x128xf32>
    tpu.vector_store %arg8[%c0_17, %c0_18], %21 {strides = array<i32>} : memref<16x128xf32, #tpu.memory_space<vmem>>, vector<16x128xf32>,
    return
  }
  func.func @transform_0(%arg0: i32) -> (i32, i32) {
    %c0_i32 = arith.constant 0 : i32
    %c0_i32_0 = arith.constant 0 : i32
    return %arg0, %c0_i32 : i32, i32
  }
  func.func @transform_1(%arg0: i32) -> (i32, i32) {
    %c0_i32 = arith.constant 0 : i32
    %c0_i32_0 = arith.constant 0 : i32
    %c0_i32_1 = arith.constant 0 : i32
    return %c0_i32, %c0_i32_0 : i32, i32
  }
  func.func @transform_2(%arg0: i32) -> (i32, i32) {
    %c0_i32 = arith.constant 0 : i32
    %c0_i32_0 = arith.constant 0 : i32
    %c0_i32_1 = arith.constant 0 : i32
    return %c0_i32, %c0_i32_0 : i32, i32
  }
  func.func @transform_3(%arg0: i32) -> (i32, i32) {
    %c0_i32 = arith.constant 0 : i32
    %c0_i32_0 = arith.constant 0 : i32
    %c0_i32_1 = arith.constant 0 : i32
    return %c0_i32, %c0_i32_0 : i32, i32
  }
  func.func @transform_4(%arg0: i32) -> (i32, i32) {
    %c0_i32 = arith.constant 0 : i32
    %c0_i32_0 = arith.constant 0 : i32
    %c0_i32_1 = arith.constant 0 : i32
    return %c0_i32, %c0_i32_0 : i32, i32
  }
  func.func @transform_5(%arg0: i32) -> (i32, i32) {
    %c0_i32 = arith.constant 0 : i32
    %c0_i32_0 = arith.constant 0 : i32
    %c0_i32_1 = arith.constant 0 : i32
    return %c0_i32, %c0_i32_0 : i32, i32
  }
  func.func @transform_6(%arg0: i32) -> (i32, i32) {
    %c0_i32 = arith.constant 0 : i32
    %c0_i32_0 = arith.constant 0 : i32
    %c0_i32_1 = arith.constant 0 : i32
    return %c0_i32, %c0_i32_0 : i32, i32
  }
  func.func @transform_7(%arg0: i32) -> (i32, i32) {
    %c0_i32 = arith.constant 0 : i32
    %c0_i32_0 = arith.constant 0 : i32
    return %arg0, %c0_i32 : i32, i32
  }
}

</mosaic_0001>

<bundles_post_ra>
// kernel: emotion_mlp_forward.1
= control target key start
LH: loop header
LB: loop body
LE: loop exit
PB: predicated region body
PF: predicated region fallthrough
CT: control target
= control target key end

     0   :  { %s2862_s1 = inlined_call_operand.vmem [shape: bf16[256,512], index: 1, kind: input, shape index: {}]   ;;  %s2863_s0 = inlined_call_operand.vmem [shape: bf16[16,256], index: 0, kind: input, shape index: {}]   ;;  %s2864_s3 = inlined_call_operand.vmem [shape: bf16[512,256], index: 3, kind: input, shape index: {}]   ;;  %s2865_s2 = inlined_call_operand.vmem [shape: f32[1,512], index: 2, kind: input, shape index: {}]   ;;  %s2866_s6 = inlined_call_operand.vmem [shape: f32[1,128], index: 6, kind: input, shape index: {}]   ;;  %s2867_s5 = inlined_call_operand.vmem [shape: bf16[256,128], index: 5, kind: input, shape index: {}]   ;;  %s2868_s4 = inlined_call_operand.vmem [shape: f32[1,256], index: 4, kind: input, shape index: {}]   ;;  %s2869_s7 = inlined_call_operand.vmem [shape: f32[16,128], index: 7, kind: output, shape index: {}]  }
   0x1   :  { %v1352_v0 = vld [vmem:[%s2862_s1 + $0xe0] sm:$0xf]  ;;  %v1846_v1 = vld [vmem:[%s2862_s1 + $0xec] sm:$0xf0]  ;;  %v1844_v5 = vld [vmem:[%s2862_s1 + $0xe4] sm:$0xf] }
   0x2   :  { %v1480_v2 = vld [vmem:[%s2862_s1 + $0x1e0] sm:$0xf]  ;;  %v1353_v3 = vor.u32 %v1846_v1, %v1352_v0  ;;  %v1878_v4 = vld [vmem:[%s2862_s1 + $0x1ec] sm:$0xf0]  ;;  %v1354_v6 = vld [vmem:[%s2862_s1 + $0xf0] sm:$0xf0] }
   0x3   :  { %v1481_v7 = vor.u32 %v1878_v4, %v1480_v2  ;;  %v1357_v8 = vor.u32 %v1844_v5, %v1354_v6  ;;  %v1876_v9 = vld [vmem:[%s2862_s1 + $0x1e4] sm:$0xf]  ;;  %v1482_v10 = vld [vmem:[%s2862_s1 + $0x1f0] sm:$0xf0]  ;;  %v1336_v11 = vld [vmem:[%s2862_s1 + $0xc0] sm:$0xf] }
   0x4   :  { %432 = vmatpush.bf16.msra.mxu0 %v1353_v3  ;;  %v1485_v12 = vor.u32 %v1876_v9, %v1482_v10  ;;  %v1842_v13 = vld [vmem:[%s2862_s1 + $0xcc] sm:$0xf0]  ;;  %v1464_v14 = vld [vmem:[%s2862_s1 + $0x1c0] sm:$0xf]  ;;  %v1840_v18 = vld [vmem:[%s2862_s1 + $0xc4] sm:$0xf] }
   0x5   :  { %v1874_v15 = vld [vmem:[%s2862_s1 + $0x1cc] sm:$0xf0]  ;;  %446 = vmatpush.bf16.msra.mxu1 %v1481_v7  ;;  %460 = vmatpush.bf16.msra.mxu2 %v1357_v8  ;;  %v1337_v16 = vor.u32 %v1842_v13, %v1336_v11  ;;  %v1338_v19 = vld [vmem:[%s2862_s1 + $0xd0] sm:$0xf0]  ;;  %v1872_v20 = vld [vmem:[%s2862_s1 + $0x1c4] sm:$0xf] }
   0x6   :  { %v1465_v17 = vor.u32 %v1874_v15, %v1464_v14  ;;  %474 = vmatpush.bf16.msra.mxu3 %v1485_v12  ;;  %v1341_v21 = vor.u32 %v1840_v18, %v1338_v19  ;;  %v1466_v22 = vld [vmem:[%s2862_s1 + $0x1d0] sm:$0xf0]  ;;  %v1320_v23 = vld [vmem:[%s2862_s1 + $0xa0] sm:$0xf]  ;;  %v1838_v24 = vld [vmem:[%s2862_s1 + $0xac] sm:$0xf0] }
   0x7   :  { %v1469_v25 = vor.u32 %v1872_v20, %v1466_v22  ;;  %v1448_v26 = vld [vmem:[%s2862_s1 + $0x1a0] sm:$0xf]  ;;  %v1870_v27 = vld [vmem:[%s2862_s1 + $0x1ac] sm:$0xf0]  ;;  %v1836_v28 = vld [vmem:[%s2862_s1 + $0xa4] sm:$0xf]  ;;  %v1321_v29 = vor.u32 %v1838_v24, %v1320_v23 }
   0x8   :  { %433 = vmatpush.bf16.msra.mxu0 %v1337_v16  ;;  %v1322_v30 = vld [vmem:[%s2862_s1 + $0xb0] sm:$0xf0]  ;;  %v1868_v31 = vld [vmem:[%s2862_s1 + $0x1a4] sm:$0xf]  ;;  %v1449_v33 = vor.u32 %v1870_v27, %v1448_v26  ;;  %v1304_v35 = vld [vmem:[%s2862_s1 + $0x80] sm:$0xf] }
   0x9   :  { %v1450_v32 = vld [vmem:[%s2862_s1 + $0x1b0] sm:$0xf0]  ;;  %447 = vmatpush.bf16.msra.mxu1 %v1465_v17  ;;  %461 = vmatpush.bf16.msra.mxu2 %v1341_v21  ;;  %v1325_v34 = vor.u32 %v1836_v28, %v1322_v30  ;;  %v1834_v36 = vld [vmem:[%s2862_s1 + $0x8c] sm:$0xf0]  ;;  %v1432_v37 = vld [vmem:[%s2862_s1 + $0x180] sm:$0xf] }
   0xa   :  { %475 = vmatpush.bf16.msra.mxu3 %v1469_v25  ;;  %v1453_v38 = vor.u32 %v1868_v31, %v1450_v32  ;;  %v1866_v39 = vld [vmem:[%s2862_s1 + $0x18c] sm:$0xf0]  ;;  %v1832_v40 = vld [vmem:[%s2862_s1 + $0x84] sm:$0xf]  ;;  %v1306_v41 = vld [vmem:[%s2862_s1 + $0x90] sm:$0xf0]  ;;  %v1305_v44 = vor.u32 %v1834_v36, %v1304_v35 }
   0xb   :  { %v1864_v42 = vld [vmem:[%s2862_s1 + $0x184] sm:$0xf]  ;;  %v1434_v43 = vld [vmem:[%s2862_s1 + $0x190] sm:$0xf0]  ;;  %v1433_v45 = vor.u32 %v1866_v39, %v1432_v37  ;;  %v1309_v46 = vor.u32 %v1832_v40, %v1306_v41  ;;  %v1288_v47 = vld [vmem:[%s2862_s1 + $0x60] sm:$0xf] }
   0xc   :  { %434 = vmatpush.bf16.msra.mxu0 %v1321_v29  ;;  %v1830_v48 = vld [vmem:[%s2862_s1 + $0x6c] sm:$0xf0]  ;;  %v1416_v49 = vld [vmem:[%s2862_s1 + $0x160] sm:$0xf]  ;;  %v1437_v50 = vor.u32 %v1864_v42, %v1434_v43  ;;  %v1828_v52 = vld [vmem:[%s2862_s1 + $0x64] sm:$0xf] }
   0xd   :  { %448 = vmatpush.bf16.msra.mxu1 %v1449_v33  ;;  %462 = vmatpush.bf16.msra.mxu2 %v1325_v34  ;;  %v1862_v51 = vld [vmem:[%s2862_s1 + $0x16c] sm:$0xf0]  ;;  %v1290_v53 = vld [vmem:[%s2862_s1 + $0x70] sm:$0xf0]  ;;  %v1860_v54 = vld [vmem:[%s2862_s1 + $0x164] sm:$0xf]  ;;  %v1289_v56 = vor.u32 %v1830_v48, %v1288_v47 }
   0xe   :  { %476 = vmatpush.bf16.msra.mxu3 %v1453_v38  ;;  %v1418_v55 = vld [vmem:[%s2862_s1 + $0x170] sm:$0xf0]  ;;  %v1417_v57 = vor.u32 %v1862_v51, %v1416_v49  ;;  %v1293_v58 = vor.u32 %v1828_v52, %v1290_v53  ;;  %v1272_v59 = vld [vmem:[%s2862_s1 + $0x40] sm:$0xf]  ;;  %v1826_v60 = vld [vmem:[%s2862_s1 + $0x4c] sm:$0xf0] }
   0xf   :  { %v1400_v61 = vld [vmem:[%s2862_s1 + $0x140] sm:$0xf]  ;;  %v1421_v62 = vor.u32 %v1860_v54, %v1418_v55  ;;  %v1858_v63 = vld [vmem:[%s2862_s1 + $0x14c] sm:$0xf0]  ;;  %v1824_v0 = vld [vmem:[%s2862_s1 + $0x44] sm:$0xf]  ;;  %v1273_v4 = vor.u32 %v1826_v60, %v1272_v59 }
  0x10   :  { %435 = vmatpush.bf16.msra.mxu0 %v1305_v44  ;;  %v1274_v1 = vld [vmem:[%s2862_s1 + $0x50] sm:$0xf0]  ;;  %v1856_v2 = vld [vmem:[%s2862_s1 + $0x144] sm:$0xf]  ;;  %v1401_v5 = vor.u32 %v1858_v63, %v1400_v61  ;;  %v1256_v7 = vld [vmem:[%s2862_s1 + $0x20] sm:$0xf] }
  0x11   :  { %449 = vmatpush.bf16.msra.mxu1 %v1433_v45  ;;  %463 = vmatpush.bf16.msra.mxu2 %v1309_v46  ;;  %v1402_v3 = vld [vmem:[%s2862_s1 + $0x150] sm:$0xf0]  ;;  %v1277_v6 = vor.u32 %v1824_v0, %v1274_v1  ;;  %v1822_v8 = vld [vmem:[%s2862_s1 + $0x2c] sm:$0xf0]  ;;  %v1384_v9 = vld [vmem:[%s2862_s1 + $0x120] sm:$0xf] }
  0x12   :  { %477 = vmatpush.bf16.msra.mxu3 %v1437_v50  ;;  %v1405_v10 = vor.u32 %v1856_v2, %v1402_v3  ;;  %v1854_v11 = vld [vmem:[%s2862_s1 + $0x12c] sm:$0xf0]  ;;  %v1820_v12 = vld [vmem:[%s2862_s1 + $0x24] sm:$0xf]  ;;  %v1258_v13 = vld [vmem:[%s2862_s1 + $0x30] sm:$0xf0]  ;;  %v1257_v16 = vor.u32 %v1822_v8, %v1256_v7 }
  0x13   :  { %v1852_v14 = vld [vmem:[%s2862_s1 + $0x124] sm:$0xf]  ;;  %v1386_v15 = vld [vmem:[%s2862_s1 + $0x130] sm:$0xf0]  ;;  %v1240_v17 = vld [vmem:[%s2862_s1] sm:$0xf]  ;;  %v1385_v20 = vor.u32 %v1854_v11, %v1384_v9  ;;  %v1261_v21 = vor.u32 %v1820_v12, %v1258_v13 }
  0x14   :  { %436 = vmatpush.bf16.msra.mxu0 %v1289_v56  ;;  %v1818_v18 = vld [vmem:[%s2862_s1 + $0xc] sm:$0xf0]  ;;  %v1368_v19 = vld [vmem:[%s2862_s1 + $0x100] sm:$0xf]  ;;  %v1816_v23 = vld [vmem:[%s2862_s1 + $0x4] sm:$0xf]  ;;  %v1389_v25 = vor.u32 %v1852_v14, %v1386_v15 }
  0x15   :  { %450 = vmatpush.bf16.msra.mxu1 %v1417_v57  ;;  %464 = vmatpush.bf16.msra.mxu2 %v1293_v58  ;;  %v1850_v22 = vld [vmem:[%s2862_s1 + $0x10c] sm:$0xf0]  ;;  %v1242_v24 = vld [vmem:[%s2862_s1 + $0x10] sm:$0xf0]  ;;  %v1848_v26 = vld [vmem:[%s2862_s1 + $0x104] sm:$0xf]  ;;  %v1241_v32 = vor.u32 %v1818_v18, %v1240_v17 }
  0x16   :  { %478 = vmatpush.bf16.msra.mxu3 %v1421_v62  ;;  %v1370_v27 = vld [vmem:[%s2862_s1 + $0x110] sm:$0xf0]  ;;  %v1360_v28 = vld [vmem:[%s2862_s1 + $0xe8] sm:$0xf]  ;;  %v1847_v29 = vld [vmem:[%s2862_s1 + $0xf4] sm:$0xf0]  ;;  %v1369_v36 = vor.u32 %v1850_v22, %v1368_v19  ;;  %v1245_v37 = vor.u32 %v1816_v23, %v1242_v24 }
  0x17   :  { %v1488_v30 = vld [vmem:[%s2862_s1 + $0x1e8] sm:$0xf]  ;;  %v1879_v31 = vld [vmem:[%s2862_s1 + $0x1f4] sm:$0xf0]  ;;  %v1845_v33 = vld [vmem:[%s2862_s1 + $0xec] sm:$0xf]  ;;  %v1373_v41 = vor.u32 %v1848_v26, %v1370_v27  ;;  %v1361_v42 = vor.u32 %v1847_v29, %v1360_v28 }
  0x18   :  { %437 = vmatpush.bf16.msra.mxu0 %v1273_v4  ;;  %v1362_v34 = vld [vmem:[%s2862_s1 + $0xf8] sm:$0xf0]  ;;  %v1877_v35 = vld [vmem:[%s2862_s1 + $0x1ec] sm:$0xf]  ;;  %v1232_v39 = vld [vmem:[%s2863_s0] sm:$0xf]  ;;  %v1489_v45 = vor.u32 %v1879_v31, %v1488_v30 }
  0x19   :  { %451 = vmatpush.bf16.msra.mxu1 %v1401_v5  ;;  %465 = vmatpush.bf16.msra.mxu2 %v1277_v6  ;;  %v1490_v38 = vld [vmem:[%s2862_s1 + $0x1f8] sm:$0xf0]  ;;  %v1815_v40 = vld [vmem:[%s2863_s0 + $0x4] sm:$0xf0]  ;;  %v1814_v43 = vld [vmem:[%s2863_s0 + $0x4] sm:$0xf]  ;;  %v1365_v46 = vor.u32 %v1845_v33, %v1362_v34 }
  0x1a   :  { %479 = vmatpush.bf16.msra.mxu3 %v1405_v10  ;;  %v1234_v44 = vld [vmem:[%s2863_s0 + $0x8] sm:$0xf0]  ;;  %v1344_v47 = vld [vmem:[%s2862_s1 + $0xc8] sm:$0xf]  ;;  %v1843_v48 = vld [vmem:[%s2862_s1 + $0xd4] sm:$0xf0]  ;;  %v1493_v50 = vor.u32 %v1877_v35, %v1490_v38  ;;  %v2238_v51 = vor.u32 %v1815_v40, %v1232_v39 }
  0x1b   :  { %v1472_v49 = vld [vmem:[%s2862_s1 + $0x1c8] sm:$0xf]  ;;  %v1875_v52 = vld [vmem:[%s2862_s1 + $0x1d4] sm:$0xf0]  ;;  %v1841_v53 = vld [vmem:[%s2862_s1 + $0xcc] sm:$0xf]  ;;  %v2249_v55 = vor.u32 %v1814_v43, %v1234_v44  ;;  %v1345_v58 = vor.u32 %v1843_v48, %v1344_v47 }
  0x1c   :  { %438 = vmatpush.bf16.msra.mxu0 %v1257_v16  ;;  %v1346_v54 = vld [vmem:[%s2862_s1 + $0xd8] sm:$0xf0]  ;;  %v1873_v56 = vld [vmem:[%s2862_s1 + $0x1cc] sm:$0xf]  ;;  %v1473_v59 = vor.u32 %v1875_v52, %v1472_v49  ;;  %v1328_v61 = vld [vmem:[%s2862_s1 + $0xa8] sm:$0xf] }
  0x1d   :  { %452 = vmatpush.bf16.msra.mxu1 %v1385_v20  ;;  %466 = vmatpush.bf16.msra.mxu2 %v1261_v21  ;;  %v1474_v57 = vld [vmem:[%s2862_s1 + $0x1d8] sm:$0xf0]  ;;  %v1349_v60 = vor.u32 %v1841_v53, %v1346_v54  ;;  %v1839_v62 = vld [vmem:[%s2862_s1 + $0xb4] sm:$0xf0]  ;;  %v1456_v63 = vld [vmem:[%s2862_s1 + $0x1a8] sm:$0xf] }
  0x1e   :  { %480 = vmatpush.bf16.msra.mxu3 %v1389_v25  ;;  %v1477_v0 = vor.u32 %v1873_v56, %v1474_v57  ;;  %v1871_v1 = vld [vmem:[%s2862_s1 + $0x1b4] sm:$0xf0]  ;;  %v1837_v2 = vld [vmem:[%s2862_s1 + $0xac] sm:$0xf]  ;;  %v1330_v3 = vld [vmem:[%s2862_s1 + $0xb8] sm:$0xf0]  ;;  %v1329_v6 = vor.u32 %v1839_v62, %v1328_v61 }
  0x1f   :  { %v1869_v4 = vld [vmem:[%s2862_s1 + $0x1ac] sm:$0xf]  ;;  %v1458_v5 = vld [vmem:[%s2862_s1 + $0x1b8] sm:$0xf0]  ;;  %v1457_v7 = vor.u32 %v1871_v1, %v1456_v63  ;;  %v1333_v8 = vor.u32 %v1837_v2, %v1330_v3  ;;  %v1312_v9 = vld [vmem:[%s2862_s1 + $0x88] sm:$0xf] }
  0x20   :  { %439 = vmatpush.bf16.msra.mxu0 %v1241_v32  ;;  %v1835_v10 = vld [vmem:[%s2862_s1 + $0x94] sm:$0xf0]  ;;  %v1440_v11 = vld [vmem:[%s2862_s1 + $0x188] sm:$0xf]  ;;  %v1461_v12 = vor.u32 %v1869_v4, %v1458_v5  ;;  %v1833_v14 = vld [vmem:[%s2862_s1 + $0x8c] sm:$0xf] }
  0x21   :  { %453 = vmatpush.bf16.msra.mxu1 %v1369_v36  ;;  %467 = vmatpush.bf16.msra.mxu2 %v1245_v37  ;;  %v1867_v13 = vld [vmem:[%s2862_s1 + $0x194] sm:$0xf0]  ;;  %v1314_v15 = vld [vmem:[%s2862_s1 + $0x98] sm:$0xf0]  ;;  %v1865_v16 = vld [vmem:[%s2862_s1 + $0x18c] sm:$0xf]  ;;  %v1313_v18 = vor.u32 %v1835_v10, %v1312_v9 }
  0x22   :  { %481 = vmatpush.bf16.msra.mxu3 %v1373_v41  ;;  %v1442_v17 = vld [vmem:[%s2862_s1 + $0x198] sm:$0xf0]  ;;  %v1441_v19 = vor.u32 %v1867_v13, %v1440_v11  ;;  %v1317_v20 = vor.u32 %v1833_v14, %v1314_v15  ;;  %v1296_v21 = vld [vmem:[%s2862_s1 + $0x68] sm:$0xf]  ;;  %v1831_v22 = vld [vmem:[%s2862_s1 + $0x74] sm:$0xf0] }
  0x23   :  { %440 = vmatmul.bf16.vlgmr.msra.gmra.mxu0 %v2238_v51  ;;  %v1424_v23 = vld [vmem:[%s2862_s1 + $0x168] sm:$0xf]  ;;  %v1445_v24 = vor.u32 %v1865_v16, %v1442_v17  ;;  %v1863_v25 = vld [vmem:[%s2862_s1 + $0x174] sm:$0xf0]  ;;  %v1829_v26 = vld [vmem:[%s2862_s1 + $0x6c] sm:$0xf]  ;;  %v1297_v30 = vor.u32 %v1831_v22, %v1296_v21 }
  0x24   :  { %488 = vmatpush.bf16.msrb.mxu0 %v1361_v42  ;;  %468 = vmatmul.bf16.vlgmr.msra.gmra.mxu2 %v2238_v51  ;;  %v1298_v27 = vld [vmem:[%s2862_s1 + $0x78] sm:$0xf0]  ;;  %v1861_v28 = vld [vmem:[%s2862_s1 + $0x16c] sm:$0xf]  ;;  %v1425_v31 = vor.u32 %v1863_v25, %v1424_v23  ;;  %v1280_v33 = vld [vmem:[%s2862_s1 + $0x48] sm:$0xf] }
  0x25   :  { %502 = vmatpush.bf16.msrb.mxu1 %v1489_v45  ;;  %516 = vmatpush.bf16.msrb.mxu2 %v1365_v46  ;;  %v1426_v29 = vld [vmem:[%s2862_s1 + $0x178] sm:$0xf0]  ;;  %v1301_v32 = vor.u32 %v1829_v26, %v1298_v27  ;;  %v1827_v34 = vld [vmem:[%s2862_s1 + $0x54] sm:$0xf0]  ;;  %v1408_v35 = vld [vmem:[%s2862_s1 + $0x148] sm:$0xf] }
  0x26   :  { %530 = vmatpush.bf16.msrb.mxu3 %v1493_v50  ;;  %454 = vmatmul.bf16.vlgmr.msra.gmra.mxu1 %v2249_v55  ;;  %v1429_v36 = vor.u32 %v1861_v28, %v1426_v29  ;;  %v1859_v37 = vld [vmem:[%s2862_s1 + $0x154] sm:$0xf0]  ;;  %v1825_v38 = vld [vmem:[%s2862_s1 + $0x4c] sm:$0xf]  ;;  %v1282_v39 = vld [vmem:[%s2862_s1 + $0x58] sm:$0xf0]  ;;  %v1281_v42 = vor.u32 %v1827_v34, %v1280_v33 }
  0x27   :  { %482 = vmatmul.bf16.vlgmr.msra.gmra.mxu3 %v2249_v55  ;;  %v1857_v40 = vld [vmem:[%s2862_s1 + $0x14c] sm:$0xf]  ;;  %v1410_v41 = vld [vmem:[%s2862_s1 + $0x158] sm:$0xf0]  ;;  %v1409_v43 = vor.u32 %v1859_v37, %v1408_v35  ;;  %v1285_v44 = vor.u32 %v1825_v38, %v1282_v39  ;;  %v1264_v45 = vld [vmem:[%s2862_s1 + $0x28] sm:$0xf] }
  0x28   :  { %489 = vmatpush.bf16.msrb.mxu0 %v1345_v58  ;;  %v1823_v46 = vld [vmem:[%s2862_s1 + $0x34] sm:$0xf0]  ;;  %v1392_v47 = vld [vmem:[%s2862_s1 + $0x128] sm:$0xf]  ;;  %v1413_v48 = vor.u32 %v1857_v40, %v1410_v41  ;;  %v1821_v50 = vld [vmem:[%s2862_s1 + $0x2c] sm:$0xf] }
  0x29   :  { %503 = vmatpush.bf16.msrb.mxu1 %v1473_v59  ;;  %517 = vmatpush.bf16.msrb.mxu2 %v1349_v60  ;;  %v1855_v49 = vld [vmem:[%s2862_s1 + $0x134] sm:$0xf0]  ;;  %v1266_v52 = vld [vmem:[%s2862_s1 + $0x38] sm:$0xf0]  ;;  %v1853_v53 = vld [vmem:[%s2862_s1 + $0x12c] sm:$0xf]  ;;  %v1265_v56 = vor.u32 %v1823_v46, %v1264_v45 }
  0x2a   :  { %531 = vmatpush.bf16.msrb.mxu3 %v1477_v0  ;;  %v1394_v54 = vld [vmem:[%s2862_s1 + $0x138] sm:$0xf0]  ;;  %v1248_v57 = vld [vmem:[%s2862_s1 + $0x8] sm:$0xf]  ;;  %v1393_v58 = vor.u32 %v1855_v49, %v1392_v47  ;;  %v1269_v59 = vor.u32 %v1821_v50, %v1266_v52  ;;  %v1819_v60 = vld [vmem:[%s2862_s1 + $0x14] sm:$0xf0] }
  0x2b   :  { %v1376_v61 = vld [vmem:[%s2862_s1 + $0x108] sm:$0xf]  ;;  %v1851_v62 = vld [vmem:[%s2862_s1 + $0x114] sm:$0xf0]  ;;  %v1397_v63 = vor.u32 %v1853_v53, %v1394_v54  ;;  %v1817_v0 = vld [vmem:[%s2862_s1 + $0xc] sm:$0xf] }
  0x2c   :  { %490 = vmatpush.bf16.msrb.mxu0 %v1329_v6  ;;  %v1250_v1 = vld [vmem:[%s2862_s1 + $0x18] sm:$0xf0]  ;;  %v1849_v2 = vld [vmem:[%s2862_s1 + $0x10c] sm:$0xf]  ;;  %v1552_v4 = vld [vmem:[%s2864_s3 + $0x70] sm:$0xf]  ;;  %v1249_v6 = vor.u32 %v1819_v60, %v1248_v57  ;;  %v1377_v9 = vor.u32 %v1851_v62, %v1376_v61 }
  0x2d   :  { %504 = vmatpush.bf16.msrb.mxu1 %v1457_v7  ;;  %518 = vmatpush.bf16.msrb.mxu2 %v1333_v8  ;;  %v1378_v3 = vld [vmem:[%s2862_s1 + $0x118] sm:$0xf0]  ;;  %v1895_v5 = vld [vmem:[%s2864_s3 + $0x74] sm:$0xf0]  ;;  %v1616_v7 = vld [vmem:[%s2864_s3 + $0xf0] sm:$0xf]  ;;  %v1253_v10 = vor.u32 %v1817_v0, %v1250_v1 }
  0x2e   :  { %532 = vmatpush.bf16.msrb.mxu3 %v1461_v12  ;;  %v1911_v8 = vld [vmem:[%s2864_s3 + $0xf4] sm:$0xf0]  ;;  %v1381_v11 = vor.u32 %v1849_v2, %v1378_v3  ;;  %v1553_v12 = vor.u32 %v1895_v5, %v1552_v4  ;;  %v1544_v13 = vld [vmem:[%s2864_s3 + $0x60] sm:$0xf]  ;;  %v1893_v14 = vld [vmem:[%s2864_s3 + $0x64] sm:$0xf0] }
  0x2f   :  { %v1617_v15 = vor.u32 %v1911_v8, %v1616_v7  ;;  %v1608_v16 = vld [vmem:[%s2864_s3 + $0xe0] sm:$0xf]  ;;  %v1909_v17 = vld [vmem:[%s2864_s3 + $0xe4] sm:$0xf0]  ;;  %v1600_v22 = vld [vmem:[%s2864_s3 + $0xd0] sm:$0xf] }
  0x30   :  { %491 = vmatpush.bf16.msrb.mxu0 %v1313_v18  ;;  %v1545_v18 = vor.u32 %v1893_v14, %v1544_v13  ;;  %v1609_v21 = vor.u32 %v1909_v17, %v1608_v16  ;;  %v1907_v23 = vld [vmem:[%s2864_s3 + $0xd4] sm:$0xf0]  ;;  %v1528_v25 = vld [vmem:[%s2864_s3 + $0x40] sm:$0xf]  ;;  %v1520_v29 = vld [vmem:[%s2864_s3 + $0x30] sm:$0xf] }
  0x31   :  { %505 = vmatpush.bf16.msrb.mxu1 %v1441_v19  ;;  %519 = vmatpush.bf16.msrb.mxu2 %v1317_v20  ;;  %v1536_v19 = vld [vmem:[%s2864_s3 + $0x50] sm:$0xf]  ;;  %v1891_v20 = vld [vmem:[%s2864_s3 + $0x54] sm:$0xf0]  ;;  %v1601_v26 = vor.u32 %v1907_v23, %v1600_v22  ;;  %v1592_v27 = vld [vmem:[%s2864_s3 + $0xc0] sm:$0xf] }
  0x32   :  { %533 = vmatpush.bf16.msrb.mxu3 %v1445_v24  ;;  %v1537_v24 = vor.u32 %v1891_v20, %v1536_v19  ;;  %v1903_v33 = vld [vmem:[%s2864_s3 + $0xb4] sm:$0xf0]  ;;  %v1512_v35 = vld [vmem:[%s2864_s3 + $0x20] sm:$0xf]  ;;  %v1901_v39 = vld [vmem:[%s2864_s3 + $0xa4] sm:$0xf0] }
  0x33   :  { %v1576_v38 = vld [vmem:[%s2864_s3 + $0xa0] sm:$0xf]  ;;  %v1504_v41 = vld [vmem:[%s2864_s3 + $0x10] sm:$0xf]  ;;  %v1881_v46 = vld [vmem:[%s2864_s3 + $0x4] sm:$0xf0] }
  0x34   :  { %492 = vmatpush.bf16.msrb.mxu0 %v1297_v30  ;;  %v1887_v30 = vld [vmem:[%s2864_s3 + $0x34] sm:$0xf0]  ;;  %v1496_v45 = vld [vmem:[%s2864_s3] sm:$0xf]  ;;  %v1894_v50 = vld [vmem:[%s2864_s3 + $0x74] sm:$0xf] }
  0x35   :  { %506 = vmatpush.bf16.msrb.mxu1 %v1425_v31  ;;  %520 = vmatpush.bf16.msrb.mxu2 %v1301_v32  ;;  %v1584_v32 = vld [vmem:[%s2864_s3 + $0xb0] sm:$0xf]  ;;  %v1521_v34 = vor.u32 %v1887_v30, %v1520_v29  ;;  %v1497_v47 = vor.u32 %v1881_v46, %v1496_v45  ;;  %v1927_v49 = vld [vmem:[%s2864_s3 + $0x174] sm:$0xf0]  ;;  %v1554_v53 = vld [vmem:[%s2864_s3 + $0x78] sm:$0xf0] }
  0x36   :  { %534 = vmatpush.bf16.msrb.mxu3 %v1429_v36  ;;  %v1885_v36 = vld [vmem:[%s2864_s3 + $0x24] sm:$0xf0]  ;;  %v1585_v37 = vor.u32 %v1903_v33, %v1584_v32  ;;  %v1568_v54 = vld [vmem:[%s2864_s3 + $0x90] sm:$0xf]  ;;  %v1557_v57 = vor.u32 %v1894_v50, %v1554_v53  ;;  %v1892_v62 = vld [vmem:[%s2864_s3 + $0x64] sm:$0xf] }
  0x37   :  { %v1513_v40 = vor.u32 %v1885_v36, %v1512_v35  ;;  %v1925_v60 = vld [vmem:[%s2864_s3 + $0x164] sm:$0xf0]  ;;  %v1560_v0 = vld [vmem:[%s2864_s3 + $0x80] sm:$0xf]  ;;  %v1744_v3 = vld [vmem:[%s2864_s3 + $0x1f0] sm:$0xf] }
  0x38   :  { %493 = vmatpush.bf16.msrb.mxu0 %v1281_v42  ;;  %v1883_v42 = vld [vmem:[%s2864_s3 + $0x14] sm:$0xf0]  ;;  %v1897_v2 = vld [vmem:[%s2864_s3 + $0x84] sm:$0xf0]  ;;  %v1910_v7 = vld [vmem:[%s2864_s3 + $0xf4] sm:$0xf] }
  0x39   :  { %507 = vmatpush.bf16.msrb.mxu1 %v1409_v43  ;;  %521 = vmatpush.bf16.msrb.mxu2 %v1285_v44  ;;  %v1577_v43 = vor.u32 %v1901_v39, %v1576_v38  ;;  %v1505_v44 = vor.u32 %v1883_v42, %v1504_v41  ;;  %v1943_v4 = vld [vmem:[%s2864_s3 + $0x1f4] sm:$0xf0]  ;;  %v1561_v5 = vor.u32 %v1897_v2, %v1560_v0  ;;  %v1618_v8 = vld [vmem:[%s2864_s3 + $0xf8] sm:$0xf0]  ;;  %v1736_v16 = vld [vmem:[%s2864_s3 + $0x1e0] sm:$0xf] }
  0x3a   :  { %535 = vmatpush.bf16.msrb.mxu3 %v1413_v48  ;;  %v1680_v48 = vld [vmem:[%s2864_s3 + $0x170] sm:$0xf]  ;;  %v1538_v14 = vld [vmem:[%s2864_s3 + $0x58] sm:$0xf0]  ;;  %v1941_v17 = vld [vmem:[%s2864_s3 + $0x1e4] sm:$0xf0] }
  0x3b   :  { %v1681_v52 = vor.u32 %v1927_v49, %v1680_v48  ;;  %v1737_v19 = vor.u32 %v1941_v17, %v1736_v16  ;;  %v1610_v20 = vld [vmem:[%s2864_s3 + $0xe8] sm:$0xf0]  ;;  %v1656_v22 = vld [vmem:[%s2864_s3 + $0x140] sm:$0xf]  ;;  %v1921_v23 = vld [vmem:[%s2864_s3 + $0x144] sm:$0xf0] }
  0x3c   :  { %494 = vmatpush.bf16.msrb.mxu0 %v1265_v56  ;;  %v1899_v56 = vld [vmem:[%s2864_s3 + $0x94] sm:$0xf0]  ;;  %v1602_v30 = vld [vmem:[%s2864_s3 + $0xd8] sm:$0xf0]  ;;  %v1648_v32 = vld [vmem:[%s2864_s3 + $0x130] sm:$0xf] }
  0x3d   :  { %508 = vmatpush.bf16.msrb.mxu1 %v1393_v58  ;;  %522 = vmatpush.bf16.msrb.mxu2 %v1269_v59  ;;  %v1569_v58 = vor.u32 %v1899_v56, %v1568_v54  ;;  %v1672_v59 = vld [vmem:[%s2864_s3 + $0x160] sm:$0xf]  ;;  %v1919_v33 = vld [vmem:[%s2864_s3 + $0x134] sm:$0xf0]  ;;  %v1522_v36 = vld [vmem:[%s2864_s3 + $0x38] sm:$0xf0] }
  0x3e   :  { %536 = vmatpush.bf16.msrb.mxu3 %v1397_v63  ;;  %v1673_v61 = vor.u32 %v1925_v60, %v1672_v59  ;;  %v1546_v63 = vld [vmem:[%s2864_s3 + $0x68] sm:$0xf0]  ;;  %v1649_v35 = vor.u32 %v1919_v33, %v1648_v32  ;;  %v1720_v38 = vld [vmem:[%s2864_s3 + $0x1c0] sm:$0xf]  ;;  %v1937_v39 = vld [vmem:[%s2864_s3 + $0x1c4] sm:$0xf0] }
  0x3f   :  { %v1549_v1 = vor.u32 %v1892_v62, %v1546_v63  ;;  %v1721_v41 = vor.u32 %v1937_v39, %v1720_v38  ;;  %v1594_v42 = vld [vmem:[%s2864_s3 + $0xc8] sm:$0xf0]  ;;  %v1917_v45 = vld [vmem:[%s2864_s3 + $0x124] sm:$0xf0]  ;;  %v1884_v46 = vld [vmem:[%s2864_s3 + $0x24] sm:$0xf] }
  0x40   :  { %495 = vmatpush.bf16.msrb.mxu0 %v1249_v6  ;;  %v1745_v6 = vor.u32 %v1943_v4, %v1744_v3  ;;  %v1514_v48 = vld [vmem:[%s2864_s3 + $0x28] sm:$0xf0]  ;;  %v2628_v49 = vld [vmem:[%s2865_s2] sm:$0xf]  ;;  %v1935_v53 = vld [vmem:[%s2864_s3 + $0x1b4] sm:$0xf0] }
  0x41   :  { %509 = vmatpush.bf16.msrb.mxu1 %v1377_v9  ;;  %523 = vmatpush.bf16.msrb.mxu2 %v1253_v10  ;;  %v1621_v9 = vor.u32 %v1910_v7, %v1618_v8  ;;  %v1664_v10 = vld [vmem:[%s2864_s3 + $0x150] sm:$0xf]  ;;  %v1517_v50 = vor.u32 %v1884_v46, %v1514_v48  ;;  %v1902_v54 = vld [vmem:[%s2864_s3 + $0xb4] sm:$0xf]  ;;  %v1915_v59 = vld [vmem:[%s2864_s3 + $0x114] sm:$0xf0] }
  0x42   :  { %537 = vmatpush.bf16.msrb.mxu3 %v1381_v11  ;;  %v1923_v11 = vld [vmem:[%s2864_s3 + $0x154] sm:$0xf0]  ;;  %v1882_v62 = vld [vmem:[%s2864_s3 + $0x14] sm:$0xf]  ;;  %v1506_v63 = vld [vmem:[%s2864_s3 + $0x18] sm:$0xf0] }
  0x43   :  { %496 = vmatmul.bf16.vlgmr.msrb.gmra.mxu0 %v2238_v51  ;;  %v1665_v13 = vor.u32 %v1923_v11, %v1664_v10  ;;  %v1704_v0 = vld [vmem:[%s2864_s3 + $0x1a0] sm:$0xf]  ;;  %v1933_v2 = vld [vmem:[%s2864_s3 + $0x1a4] sm:$0xf0]  ;;  %v1900_v3 = vld [vmem:[%s2864_s3 + $0xa4] sm:$0xf] }
  0x44   :  { %946 = vmatpush.bf16.msra.mxu0 %v1553_v12  ;;  %510 = vmatmul.bf16.vlgmr.msrb.gmra.mxu1 %v2249_v55  ;;  %v1890_v12 = vld [vmem:[%s2864_s3 + $0x54] sm:$0xf]  ;;  %v1578_v4 = vld [vmem:[%s2864_s3 + $0xa8] sm:$0xf0]  ;;  %v94_v7 = vperm.slane %v2628_v49, 0 }
  0x45   :  { %960 = vmatpush.bf16.msra.mxu1 %v1617_v15  ;;  %524 = vmatmul.bf16.vlgmr.msrb.gmra.mxu2 %v2238_v51  ;;  %v1889_v51 = vld [vmem:[%s2864_s3 + $0x44] sm:$0xf0]  ;;  %v1541_v15 = vor.u32 %v1890_v12, %v1538_v14  ;;  %v1624_v8 = vld [vmem:[%s2864_s3 + $0x100] sm:$0xf]  ;;  %v1880_v10 = vld [vmem:[%s2864_s3 + $0x4] sm:$0xf] }
  0x46   :  { %538 = vmatmul.bf16.vlgmr.msrb.gmra.mxu3 %v2249_v55  ;;  %v1905_v55 = vld [vmem:[%s2864_s3 + $0xc4] sm:$0xf0]  ;;  %v1529_v28 = vor.u32 %v1889_v51, %v1528_v25  ;;  %974 = vmatpush.bf16.msra.mxu2 %v1681_v52  ;;  %v1657_v25 = vor.u32 %v1921_v23, %v1656_v22  ;;  %v1530_v51 = vld [vmem:[%s2864_s3 + $0x48] sm:$0xf0]  ;;  %v1712_v52 = vld [vmem:[%s2864_s3 + $0x1b0] sm:$0xf] }
  0x47   :  { %v1593_v31 = vor.u32 %v1905_v55, %v1592_v27  ;;  %988 = vmatpush.bf16.msra.mxu3 %v1745_v6  ;;  %v1728_v27 = vld [vmem:[%s2864_s3 + $0x1d0] sm:$0xf]  ;;  %v1939_v55 = vld [vmem:[%s2864_s3 + $0x1d4] sm:$0xf0]  ;;  %v1713_v56 = vor.u32 %v1935_v53, %v1712_v52  ;;  %v1581_v6 = vor.u32 %v1900_v3, %v1578_v4  ;;  %v1498_v12 = vld [vmem:[%s2864_s3 + $0x8] sm:$0xf0] }
  0x48   :  { %947 = vmatpush.bf16.msra.mxu0 %v1545_v18  ;;  %v1908_v18 = vld [vmem:[%s2864_s3 + $0xe4] sm:$0xf]  ;;  %v1729_v29 = vor.u32 %v1939_v55, %v1728_v27  ;;  %v1682_v14 = vld [vmem:[%s2864_s3 + $0x178] sm:$0xf0]  ;;  %v1696_v17 = vld [vmem:[%s2864_s3 + $0x190] sm:$0xf] }
  0x49   :  { %961 = vmatpush.bf16.msra.mxu1 %v1609_v21  ;;  %v1613_v21 = vor.u32 %v1908_v18, %v1610_v20  ;;  %v1931_v18 = vld [vmem:[%s2864_s3 + $0x194] sm:$0xf0]  ;;  %v1570_v22 = vld [vmem:[%s2864_s3 + $0x98] sm:$0xf0]  ;;  %v1688_v55 = vld [vmem:[%s2864_s3 + $0x180] sm:$0xf] }
  0x4a   :  { %975 = vmatpush.bf16.msra.mxu2 %v1673_v61  ;;  %v1942_v32 = vld [vmem:[%s2864_s3 + $0x1f4] sm:$0xf]  ;;  %v1746_v33 = vld [vmem:[%s2864_s3 + $0x1f8] sm:$0xf0]  ;;  %v1920_v52 = vld [vmem:[%s2864_s3 + $0x144] sm:$0xf] }
  0x4b   :  { %989 = vmatpush.bf16.msra.mxu3 %v1737_v19  ;;  %v1898_v19 = vld [vmem:[%s2864_s3 + $0x94] sm:$0xf]  ;;  %v1666_v38 = vld [vmem:[%s2864_s3 + $0x158] sm:$0xf0]  ;;  %v1658_v53 = vld [vmem:[%s2864_s3 + $0x148] sm:$0xf0] }
  0x4c   :  { %948 = vmatpush.bf16.msra.mxu0 %v1537_v24  ;;  %v1888_v24 = vld [vmem:[%s2864_s3 + $0x44] sm:$0xf] }
  0x4d   :  { %962 = vmatpush.bf16.msra.mxu1 %v1601_v26  ;;  %v1533_v26 = vor.u32 %v1888_v24, %v1530_v51  ;;  %v1573_v24 = vor.u32 %v1898_v19, %v1570_v22  ;;  %v1674_v51 = vld [vmem:[%s2864_s3 + $0x168] sm:$0xf0]  ;;  %v1634_v19 = vld [vmem:[%s2864_s3 + $0x118] sm:$0xf0] }
  0x4e   :  { %976 = vmatpush.bf16.msra.mxu2 %v1665_v13  ;;  %v1926_v13 = vld [vmem:[%s2864_s3 + $0x174] sm:$0xf] }
  0x4f   :  { %990 = vmatpush.bf16.msra.mxu3 %v1729_v29  ;;  %v1685_v16 = vor.u32 %v1926_v13, %v1682_v14  ;;  %v1896_v29 = vld [vmem:[%s2864_s3 + $0x84] sm:$0xf] }
  0x50   :  { %949 = vmatpush.bf16.msra.mxu0 %v1529_v28  ;;  %v1906_v28 = vld [vmem:[%s2864_s3 + $0xd4] sm:$0xf] }
  0x51   :  { %963 = vmatpush.bf16.msra.mxu1 %v1593_v31  ;;  %v1605_v31 = vor.u32 %v1906_v28, %v1602_v30  ;;  %v1929_v28 = vld [vmem:[%s2864_s3 + $0x184] sm:$0xf0] }
  0x52   :  { %977 = vmatpush.bf16.msra.mxu2 %v1657_v25  ;;  %v1924_v25 = vld [vmem:[%s2864_s3 + $0x164] sm:$0xf]  ;;  %v1689_v30 = vor.u32 %v1929_v28, %v1688_v55 }
  0x53   :  { %991 = vmatpush.bf16.msra.mxu3 %v1721_v41  ;;  %v1677_v27 = vor.u32 %v1924_v25, %v1674_v51  ;;  %v1626_v25 = vld [vmem:[%s2864_s3 + $0x108] sm:$0xf0] }
  0x54   :  { %950 = vmatpush.bf16.msra.mxu0 %v1521_v34  ;;  %v1886_v34 = vld [vmem:[%s2864_s3 + $0x34] sm:$0xf] }
  0x55   :  { %964 = vmatpush.bf16.msra.mxu1 %v1585_v37  ;;  %v1525_v37 = vor.u32 %v1886_v34, %v1522_v36  ;;  %v95_v36 = vperm.slane %v2628_v49, 1 }
  0x56   :  { %978 = vmatpush.bf16.msra.mxu2 %v1649_v35  ;;  %v1749_v35 = vor.u32 %v1942_v32, %v1746_v33  ;;  %v1928_v32 = vld [vmem:[%s2864_s3 + $0x184] sm:$0xf]  ;;  %v1690_v33 = vld [vmem:[%s2864_s3 + $0x188] sm:$0xf0] }
  0x57   :  { %992 = vmatpush.bf16.msra.mxu3 %v1713_v56 }
  0x58   :  { %951 = vmatpush.bf16.msra.mxu0 %v1513_v40  ;;  %v1904_v40 = vld [vmem:[%s2864_s3 + $0xc4] sm:$0xf] }
  0x59   :  { %965 = vmatpush.bf16.msra.mxu1 %v1577_v43  ;;  %v1597_v43 = vor.u32 %v1904_v40, %v1594_v42 }
  0x5c   :  { %952 = vmatpush.bf16.msra.mxu0 %v1505_v44  ;;  %v1640_v44 = vld [vmem:[%s2864_s3 + $0x120] sm:$0xf] }
  0x5d   :  { %966 = vmatpush.bf16.msra.mxu1 %v1569_v58  ;;  %v1632_v58 = vld [vmem:[%s2864_s3 + $0x110] sm:$0xf] }
  0x5e   :  { %v1633_v61 = vor.u32 %v1915_v59, %v1632_v58  ;;  %v1938_v58 = vld [vmem:[%s2864_s3 + $0x1d4] sm:$0xf]  ;;  %v1730_v59 = vld [vmem:[%s2864_s3 + $0x1d8] sm:$0xf0] }
  0x60   :  { %953 = vmatpush.bf16.msra.mxu0 %v1497_v47  ;;  %v1641_v47 = vor.u32 %v1917_v45, %v1640_v44  ;;  %v1940_v44 = vld [vmem:[%s2864_s3 + $0x1e4] sm:$0xf]  ;;  %v1738_v45 = vld [vmem:[%s2864_s3 + $0x1e8] sm:$0xf0] }
  0x61   :  { %967 = vmatpush.bf16.msra.mxu1 %v1561_v5  ;;  %v1705_v5 = vor.u32 %v1933_v2, %v1704_v0  ;;  %v1741_v48 = vor.u32 %v1940_v44, %v1738_v45  ;;  %v1650_v0 = vld [vmem:[%s2864_s3 + $0x138] sm:$0xf0] }
  0x62   :  { %979 = vmatpush.bf16.msra.mxu2 %v1641_v47 }
  0x63   :  { %993 = vmatpush.bf16.msra.mxu3 %v1705_v5 }
  0x64   :  { %1002 = vmatpush.bf16.msrb.mxu0 %v1557_v57  ;;  %v1586_v57 = vld [vmem:[%s2864_s3 + $0xb8] sm:$0xf0] }
  0x65   :  { %1016 = vmatpush.bf16.msrb.mxu1 %v1621_v9  ;;  %v1589_v60 = vor.u32 %v1902_v54, %v1586_v57  ;;  %v1913_v9 = vld [vmem:[%s2864_s3 + $0x104] sm:$0xf0]  ;;  %v1661_v57 = vor.u32 %v1920_v52, %v1658_v53 }
  0x66   :  { %980 = vmatpush.bf16.msra.mxu2 %v1633_v61  ;;  %v1625_v11 = vor.u32 %v1913_v9, %v1624_v8  ;;  %v1733_v61 = vor.u32 %v1938_v58, %v1730_v59  ;;  %v1951_v58 = vld [vmem:[%s2867_s5 + $0x38] sm:$0xff]  ;;  %v1950_v59 = vld [vmem:[%s2867_s5 + $0x30] sm:$0xff] }
  0x68   :  { %1003 = vmatpush.bf16.msrb.mxu0 %v1549_v1  ;;  %v1509_v1 = vor.u32 %v1882_v62, %v1506_v63  ;;  %v1918_v63 = vld [vmem:[%s2864_s3 + $0x134] sm:$0xf] }
  0x69   :  { %1017 = vmatpush.bf16.msrb.mxu1 %v1613_v21  ;;  %v1697_v21 = vor.u32 %v1931_v18, %v1696_v17  ;;  %v1653_v3 = vor.u32 %v1918_v63, %v1650_v0  ;;  %v1914_v18 = vld [vmem:[%s2864_s3 + $0x114] sm:$0xf]  ;;  %v1959_v63 = vld [vmem:[%s2867_s5 + $0x78] sm:$0xff] }
  0x6a   :  { %981 = vmatpush.bf16.msra.mxu2 %v1625_v11  ;;  %v1916_v11 = vld [vmem:[%s2864_s3 + $0x124] sm:$0xf]  ;;  %v1637_v22 = vor.u32 %v1914_v18, %v1634_v19  ;;  %v1946_v0 = vld [vmem:[%s2867_s5 + $0x10] sm:$0xff] }
  0x6b   :  { %994 = vmatpush.bf16.msra.mxu3 %v1697_v21 }
  0x6c   :  { %1004 = vmatpush.bf16.msrb.mxu0 %v1541_v15  ;;  %v1501_v15 = vor.u32 %v1880_v10, %v1498_v12  ;;  %v1642_v12 = vld [vmem:[%s2864_s3 + $0x128] sm:$0xf0] }
  0x6d   :  { %1018 = vmatpush.bf16.msrb.mxu1 %v1605_v31  ;;  %v1562_v31 = vld [vmem:[%s2864_s3 + $0x88] sm:$0xf0]  ;;  %v1645_v13 = vor.u32 %v1916_v11, %v1642_v12  ;;  %v620_v11 = vld [vmem:[%s2868_s4] sm:$0x3] }
  0x6e   :  { %1030 = vmatpush.bf16.msrb.mxu2 %v1685_v16  ;;  %v1565_v34 = vor.u32 %v1896_v29, %v1562_v31  ;;  %v1714_v16 = vld [vmem:[%s2864_s3 + $0x1b8] sm:$0xf0] }
  0x6f   :  { %995 = vmatpush.bf16.msra.mxu3 %v1689_v30  ;;  %v96_v30 = vperm.slane %v2628_v49, 2 }
  0x70   :  { %1005 = vmatpush.bf16.msrb.mxu0 %v1533_v26 }
  0x71   :  { %1019 = vmatpush.bf16.msrb.mxu1 %v1597_v43 }
  0x72   :  { %1031 = vmatpush.bf16.msrb.mxu2 %v1677_v27  ;;  %v1698_v27 = vld [vmem:[%s2864_s3 + $0x198] sm:$0xf0] }
  0x73   :  { %1044 = vmatpush.bf16.msrb.mxu3 %v1749_v35 }
  0x74   :  { %1006 = vmatpush.bf16.msrb.mxu0 %v1525_v37  ;;  %v1922_v37 = vld [vmem:[%s2864_s3 + $0x154] sm:$0xf] }
  0x75   :  { %1020 = vmatpush.bf16.msrb.mxu1 %v1589_v60  ;;  %v1669_v41 = vor.u32 %v1922_v37, %v1666_v38  ;;  %v97_v37 = vperm.slane %v2628_v49, 3 }
  0x77   :  { %1032 = vmatpush.bf16.msrb.mxu2 %v1669_v41  ;;  %1045 = vmatpush.bf16.msrb.mxu3 %v1741_v48 }
  0x78   :  { %1007 = vmatpush.bf16.msrb.mxu0 %v1517_v50 }
  0x79   :  { %1021 = vmatpush.bf16.msrb.mxu1 %v1581_v6  ;;  %v1936_v6 = vld [vmem:[%s2864_s3 + $0x1c4] sm:$0xf] }
  0x7b   :  { %1033 = vmatpush.bf16.msrb.mxu2 %v1661_v57  ;;  %1046 = vmatpush.bf16.msrb.mxu3 %v1733_v61  ;;  %v1948_v61 = vld [vmem:[%s2867_s5 + $0x20] sm:$0xff] }
  0x7c   :  { %1008 = vmatpush.bf16.msrb.mxu0 %v1509_v1 }
  0x7d   :  { %1022 = vmatpush.bf16.msrb.mxu1 %v1573_v24  ;;  %v1912_v24 = vld [vmem:[%s2864_s3 + $0x104] sm:$0xf] }
  0x7e   :  { %v1629_v55 = vor.u32 %v1912_v24, %v1626_v25 }
  0x7f   :  { %1034 = vmatpush.bf16.msrb.mxu2 %v1653_v3  ;;  %v1957_v3 = vld [vmem:[%s2867_s5 + $0x68] sm:$0xff] }
  0x80   :  { %1009 = vmatpush.bf16.msrb.mxu0 %v1501_v15  ;;  %v1934_v15 = vld [vmem:[%s2864_s3 + $0x1b4] sm:$0xf] }
  0x81   :  { %1023 = vmatpush.bf16.msrb.mxu1 %v1565_v34  ;;  %v1717_v17 = vor.u32 %v1934_v15, %v1714_v16  ;;  %v1693_v34 = vor.u32 %v1928_v32, %v1690_v33 }
  0x83   :  { %1035 = vmatpush.bf16.msrb.mxu2 %v1645_v13  ;;  %v622_v13 = vperm.slane %v620_v11, 0 }
  0x87   :  { %1036 = vmatpush.bf16.msrb.mxu2 %v1637_v22 }
  0x8b   :  { %1037 = vmatpush.bf16.msrb.mxu2 %v1629_v55 }
  0xa0   :  { %v441_v20 = vpop.f32.mrf.mxu0 }
  0xa1   :  { %v442_v26 = vadd.f32 %v441_v20, %v94_v7  ;;  %v1932_v20 = vld [vmem:[%s2864_s3 + $0x1a4] sm:$0xf] }
  0xa3   :  { %v455_v23 = vpop.f32.mrf.mxu1 }
  0xa4   :  { %v456_v39 = vadd.f32 %v455_v23, %v442_v26  ;;  %v1706_v23 = vld [vmem:[%s2864_s3 + $0x1a8] sm:$0xf0]  ;;  %v1930_v26 = vld [vmem:[%s2864_s3 + $0x194] sm:$0xf] }
  0xa5   :  { %v1709_v51 = vor.u32 %v1932_v20, %v1706_v23  ;;  %v1701_v28 = vor.u32 %v1930_v26, %v1698_v27 }
  0xa6   :  { %v544_v54 = vmax.f32 %v456_v39, 0.0 }
  0xa7   :  { %v469_v40 = vpop.f32.mrf.mxu2 }
  0xa8   :  { %v443_v42 = vpop.f32.mrf.mxu0  ;;  %v470_v50 = vadd.f32 %v469_v40, %v95_v36 }
  0xa9   :  { %v444_v46 = vadd.f32 %v443_v42, %v94_v7  ;;  %v1722_v7 = vld [vmem:[%s2864_s3 + $0x1c8] sm:$0xf0] }
  0xaa   :  { %v483_v43 = vpop.f32.mrf.mxu3  ;;  %v1725_v8 = vor.u32 %v1936_v6, %v1722_v7  ;;  %v1955_v6 = vld [vmem:[%s2867_s5 + $0x58] sm:$0xff] }
  0xab   :  { %v457_v47 = vpop.f32.mrf.mxu1  ;;  %v484_v62 = vadd.f32 %v483_v43, %v470_v50 }
  0xac   :  { %v458_v56 = vadd.f32 %v457_v47, %v444_v46  ;;  %1047 = vmatpush.bf16.msrb.mxu3 %v1725_v8  ;;  %v1954_v8 = vld [vmem:[%s2867_s5 + $0x50] sm:$0xff] }
  0xad   :  { %v545_v9 = vmax.f32 %v484_v62, 0.0  ;;  %v1947_v62 = vld [vmem:[%s2867_s5 + $0x18] sm:$0xff] }
  0xae   :  { %v548_v60 = vmax.f32 %v458_v56, 0.0 }
  0xaf   :  { %v471_v2 = vpop.f32.mrf.mxu2 }
  0xb0   :  { %v552_v1 = vpack.c.bf16 %v548_v60, %v544_v54  ;;  %v472_v4 = vadd.f32 %v471_v2, %v95_v36  ;;  %1048 = vmatpush.bf16.msrb.mxu3 %v1717_v17  ;;  %v1949_v60 = vld [vmem:[%s2867_s5 + $0x28] sm:$0xff] }
  0xb1   :  { %v1945_v2 = vld [vmem:[%s2867_s5 + $0x8] sm:$0xff] }
  0xb2   :  { %v485_v5 = vpop.f32.mrf.mxu3  ;;  %954 = vmatmul.bf16.vlgmr.msra.gmra.mxu0 %v552_v1 }
  0xb3   :  { %v486_v10 = vadd.f32 %v485_v5, %v472_v4  ;;  %1196 = vmatpush.bf16.msra.mxu0 %v1951_v58  ;;  %v1944_v4 = vld [vmem:[%s2867_s5] sm:$0xff] }
  0xb4   :  { %1049 = vmatpush.bf16.msrb.mxu3 %v1709_v51  ;;  %v1956_v5 = vld [vmem:[%s2867_s5 + $0x60] sm:$0xff] }
  0xb5   :  { %v549_v14 = vmax.f32 %v486_v10, 0.0  ;;  %v1953_v10 = vld [vmem:[%s2867_s5 + $0x48] sm:$0xff] }
  0xb7   :  { %v553_v21 = vpack.c.bf16 %v549_v14, %v545_v9  ;;  %1197 = vmatpush.bf16.msra.mxu0 %v1950_v59  ;;  %v1952_v14 = vld [vmem:[%s2867_s5 + $0x40] sm:$0xff] }
  0xb8   :  { %1050 = vmatpush.bf16.msrb.mxu3 %v1701_v28 }
  0xb9   :  { %968 = vmatmul.bf16.vlgmr.msra.gmra.mxu1 %v553_v21 }
  0xba   :  { %1210 = vmatpush.bf16.msra.mxu1 %v1959_v63 }
  0xbb   :  { %1198 = vmatpush.bf16.msra.mxu0 %v1949_v60 }
  0xbc   :  { %1051 = vmatpush.bf16.msrb.mxu3 %v1693_v34 }
  0xbf   :  { %1199 = vmatpush.bf16.msra.mxu0 %v1948_v61 }
  0xc0   :  { %v497_v29 = vpop.f32.mrf.mxu0 }
  0xc1   :  { %v511_v31 = vpop.f32.mrf.mxu1  ;;  %v498_v35 = vadd.f32 %v497_v29, %v96_v30 }
  0xc2   :  { %1010 = vmatmul.bf16.vlgmr.msrb.gmra.mxu0 %v552_v1  ;;  %v1958_v1 = vld [vmem:[%s2867_s5 + $0x70] sm:$0xff] }
  0xc3   :  { %v512_v40 = vadd.f32 %v511_v31, %v498_v35  ;;  %1200 = vmatpush.bf16.msra.mxu0 %v1947_v62  ;;  %1211 = vmatpush.bf16.msra.mxu1 %v1958_v1  ;;  %v623_v31 = vperm.slane %v620_v11, 1 }
  0xc5   :  { %v546_v45 = vmax.f32 %v512_v40, 0.0 }
  0xc7   :  { %1201 = vmatpush.bf16.msra.mxu0 %v1946_v0  ;;  %1212 = vmatpush.bf16.msra.mxu1 %v1957_v3 }
  0xc8   :  { %v525_v36 = vpop.f32.mrf.mxu2  ;;  %v499_v39 = vpop.f32.mrf.mxu0 }
  0xc9   :  { %v539_v38 = vpop.f32.mrf.mxu3  ;;  %v500_v41 = vadd.f32 %v499_v39, %v96_v30  ;;  %v513_v42 = vpop.f32.mrf.mxu1  ;;  %1024 = vmatmul.bf16.vlgmr.msrb.gmra.mxu1 %v553_v21  ;;  %v526_v44 = vadd.f32 %v525_v36, %v97_v37 }
  0xcb   :  { %v514_v43 = vadd.f32 %v513_v42, %v500_v41  ;;  %v540_v50 = vadd.f32 %v539_v38, %v526_v44  ;;  %1202 = vmatpush.bf16.msra.mxu0 %v1945_v2  ;;  %1213 = vmatpush.bf16.msra.mxu1 %v1956_v5 }
  0xcd   :  { %v550_v46 = vmax.f32 %v514_v43, 0.0  ;;  %v547_v56 = vmax.f32 %v540_v50, 0.0 }
  0xcf   :  { %v554_v47 = vpack.c.bf16 %v550_v46, %v546_v45  ;;  %1203 = vmatpush.bf16.msra.mxu0 %v1944_v4  ;;  %1214 = vmatpush.bf16.msra.mxu1 %v1955_v6 }
  0xd0   :  { %v527_v48 = vpop.f32.mrf.mxu2 }
  0xd1   :  { %v528_v52 = vadd.f32 %v527_v48, %v97_v37  ;;  %v541_v53 = vpop.f32.mrf.mxu3  ;;  %982 = vmatmul.bf16.vlgmr.msra.gmra.mxu2 %v554_v47 }
  0xd3   :  { %v542_v54 = vadd.f32 %v541_v53, %v528_v52  ;;  %1215 = vmatpush.bf16.msra.mxu1 %v1954_v8  ;;  %v1960_v52 = vld [vmem:[%s2866_s6] ss:$0 sm:$0xff] }
  0xd5   :  { %v551_v57 = vmax.f32 %v542_v54, 0.0 }
  0xd7   :  { %v555_v49 = vpack.c.bf16 %v551_v57, %v547_v56  ;;  %1216 = vmatpush.bf16.msra.mxu1 %v1953_v10 }
  0xd9   :  { %996 = vmatmul.bf16.vlgmr.msra.gmra.mxu3 %v555_v49 }
  0xdb   :  { %1217 = vmatpush.bf16.msra.mxu1 %v1952_v14 }
  0xe1   :  { %1038 = vmatmul.bf16.vlgmr.msrb.gmra.mxu2 %v554_v47 }
  0xe9   :  { %1052 = vmatmul.bf16.vlgmr.msrb.gmra.mxu3 %v555_v49 }
 0x12f   :  { %v955_v7 = vpop.f32.mrf.mxu0 }
 0x130   :  { %v956_v17 = vadd.f32 %v955_v7, %v622_v13 }
 0x136   :  { %v969_v9 = vpop.f32.mrf.mxu1 }
 0x137   :  { %v957_v15 = vpop.f32.mrf.mxu0  ;;  %v970_v20 = vadd.f32 %v969_v9, %v956_v17 }
 0x138   :  { %v958_v21 = vadd.f32 %v957_v15, %v622_v13 }
 0x13e   :  { %v971_v16 = vpop.f32.mrf.mxu1 }
 0x13f   :  { %v972_v22 = vadd.f32 %v971_v16, %v958_v21  ;;  %v1011_v24 = vpop.f32.mrf.mxu0 }
 0x140   :  { %v1012_v35 = vadd.f32 %v1011_v24, %v623_v31 }
 0x146   :  { %v1025_v26 = vpop.f32.mrf.mxu1 }
 0x147   :  { %v1013_v33 = vpop.f32.mrf.mxu0  ;;  %v1026_v37 = vadd.f32 %v1025_v26, %v1012_v35 }
 0x148   :  { %v1014_v38 = vadd.f32 %v1013_v33, %v623_v31 }
 0x14e   :  { %v1027_v36 = vpop.f32.mrf.mxu1 }
 0x14f   :  { %v1028_v40 = vadd.f32 %v1027_v36, %v1014_v38 }
 0x154   :  { %v983_v12 = vpop.f32.mrf.mxu2 }
 0x155   :  { %v984_v23 = vadd.f32 %v983_v12, %v970_v20 }
 0x15c   :  { %v997_v18 = vpop.f32.mrf.mxu3  ;;  %v985_v19 = vpop.f32.mrf.mxu2 }
 0x15d   :  { %v998_v25 = vadd.f32 %v997_v18, %v984_v23  ;;  %v986_v51 = vadd.f32 %v985_v19, %v972_v22 }
 0x15f   :  { %v1058_v29 = vmax.f32 %v998_v25, 0.0 }
 0x164   :  { %v999_v27 = vpop.f32.mrf.mxu3  ;;  %v1039_v28 = vpop.f32.mrf.mxu2 }
 0x165   :  { %v1000_v55 = vadd.f32 %v999_v27, %v986_v51  ;;  %v1040_v41 = vadd.f32 %v1039_v28, %v1026_v37 }
 0x167   :  { %v1060_v30 = vmax.f32 %v1000_v55, 0.0 }
 0x169   :  { %v1062_v32 = vpack.c.bf16 %v1060_v30, %v1058_v29 }
 0x16b   :  { %1204 = vmatmul.bf16.vlgmr.msra.gmra.mxu0 %v1062_v32 }
 0x16c   :  { %v1053_v34 = vpop.f32.mrf.mxu3  ;;  %v1041_v39 = vpop.f32.mrf.mxu2 }
 0x16d   :  { %v1054_v42 = vadd.f32 %v1053_v34, %v1040_v41  ;;  %v1042_v43 = vadd.f32 %v1041_v39, %v1028_v40 }
 0x16f   :  { %v1059_v46 = vmax.f32 %v1054_v42, 0.0 }
 0x174   :  { %v1055_v44 = vpop.f32.mrf.mxu3 }
 0x175   :  { %v1056_v45 = vadd.f32 %v1055_v44, %v1042_v43 }
 0x177   :  { %v1061_v47 = vmax.f32 %v1056_v45, 0.0 }
 0x179   :  { %v1063_v48 = vpack.c.bf16 %v1061_v47, %v1059_v46 }
 0x17b   :  { %1218 = vmatmul.bf16.vlgmr.msra.gmra.mxu1 %v1063_v48 }
 0x1e8   :  { %v1205_v50 = vpop.f32.mrf.mxu0 }
 0x1e9   :  { %v1206_v53 = vadd.f32 %v1960_v52, %v1205_v50 }
 0x1f0   :  { %v1207_v57 = vpop.f32.mrf.mxu0 }
 0x1f1   :  { %v1208_v49 = vadd.f32 %v1960_v52, %v1207_v57 }
 0x1f8   :  { %v1219_v54 = vpop.f32.mrf.mxu1 }
 0x1f9   :  { %v1220_v56 = vadd.f32 %v1219_v54, %v1206_v53 }
 0x1fb   :  { %1224 = vst [vmem:[%s2869_s7] sm:$0xff] %v1220_v56 }
 0x200   :  { %v1221_v58 = vpop.f32.mrf.mxu1 }
 0x201   :  { %v1222_v59 = vadd.f32 %v1221_v58, %v1208_v49 }
 0x203   :  { %1225 = vst [vmem:[%s2869_s7 + $0x8] sm:$0xff] %v1222_v59 }

</bundles_post_ra>
